<compile_context>
chip_gen: v7x
topology: tpu7x:2x2x1
jax: 0.10.0
libtpu: 0.0.40
codegen_flags: <defaults>
</compile_context>

<pallas_src>
import jax
import jax.numpy as jnp
from jax.experimental import pallas as pl
from jax.experimental.pallas import tpu as pltpu


def _round_up(n, m):
    return ((n + m - 1) // m) * m


def _device_kind():
    try:
        return jax.devices()[0].device_kind.lower()
    except Exception:  # pragma: no cover - defensive
        return ""


def _pad2d(a, rows, cols, dtype):
    """Zero-pad a 2D array up to (rows, cols) and cast to dtype (one-time use)."""
    a = jnp.asarray(a, dtype)
    return jnp.pad(a, ((0, rows - a.shape[0]), (0, cols - a.shape[1])))


def _vmem_estimate(TB, S_pad, H_pad, A_pad, a_out, cbytes, obytes):
    """Rough VMEM bytes: double-buffered x/out tiles, resident weights/biases,
    live f32 h1/h2 + bf16 casts, layer-3 accumulator."""
    return (
        2 * TB * S_pad * cbytes                                        # x tiles
        + 2 * TB * a_out * obytes                                      # out tiles
        + 2 * (S_pad * H_pad + H_pad * H_pad + H_pad * A_pad) * cbytes  # weights
        + 2 * (2 * H_pad + a_out) * 4                                  # biases
        + 3 * TB * H_pad * (4 + cbytes)                                # h1/h2 + casts
        + TB * A_pad * 4                                               # layer-3 acc
    )


def qnet_kernel(x_ref, w1_ref, b1_ref, w2_ref, b2_ref, w3_ref, b3_ref, o_ref):
    """One batch tile of the fused 3-layer MLP."""
    cdt = w1_ref.dtype  # MXU operand dtype (bf16 on the fast path)

    # Layer 1: MXU matmul with f32 accumulate; bias add + ReLU in f32 (VPU).
    h1 = jnp.dot(x_ref[...], w1_ref[...], preferred_element_type=jnp.float32)
    h1 = jnp.maximum(h1 + b1_ref[...], 0.0)

    # Layer 2.
    h2 = jnp.dot(h1.astype(cdt), w2_ref[...], preferred_element_type=jnp.float32)
    h2 = jnp.maximum(h2 + b2_ref[...], 0.0)

    # Layer 3: Q-values, no activation.  Matmul runs lane-padded (A_pad wide)
    # in VMEM; only the real action_dim columns are biased and written back.
    q = jnp.dot(h2.astype(cdt), w3_ref[...], preferred_element_type=jnp.float32)
    a_out = o_ref.shape[-1]
    o_ref[...] = (q[:, :a_out] + b3_ref[...]).astype(o_ref.dtype)


def prepare_qnet_params(params, *, compute_dtype=jnp.bfloat16):
    """One-time padding/casting of weights & biases (hoist out of the forward path).

    params: dict with w1,b1,w2,b2,w3,b3; w_i are [in, out], b_i are [out] or [1, out].
    """
    w1, w2, w3 = params["w1"], params["w2"], params["w3"]
    b1 = jnp.atleast_2d(params["b1"])
    b2 = jnp.atleast_2d(params["b2"])
    b3 = jnp.atleast_2d(params["b3"])

    state_dim, hidden_dim = w1.shape
    action_dim = w3.shape[1]

    S_pad = _round_up(state_dim, 8)                       # sublane granule
    h_granule = 256 if hidden_dim >= 512 else 128         # 2x256 MXU on v6e/v7x
    H_pad = _round_up(hidden_dim, h_granule)              # lane-dense hidden
    A_pad = _round_up(action_dim, 128)                    # lane-padded matmul width

    return {
        "w1": _pad2d(w1, S_pad, H_pad, compute_dtype),
        "w2": _pad2d(w2, H_pad, H_pad, compute_dtype),
        "w3": _pad2d(w3, H_pad, A_pad, compute_dtype),
        "b1": _pad2d(b1, 1, H_pad, jnp.float32),
        "b2": _pad2d(b2, 1, H_pad, jnp.float32),
        "b3": b3.astype(jnp.float32),                     # unpadded; added post-slice
        "dims": (state_dim, hidden_dim, action_dim, S_pad, H_pad, A_pad),
        "compute_dtype": compute_dtype,
    }


def qnet_forward(x, prepared, *, batch_tile=None, out_dtype=jnp.float32):
    """x: [B, state_dim] f32; prepared: output of prepare_qnet_params().

    out_dtype=jnp.bfloat16 halves the remaining output writeback if downstream
    tolerates it.
    """
    state_dim, hidden_dim, action_dim, S_pad, H_pad, A_pad = prepared["dims"]
    compute_dtype = prepared["compute_dtype"]
    B, in_dim = x.shape
    assert in_dim == state_dim, (in_dim, state_dim)

    kind = _device_kind()
    big_vmem = ("v5" in kind) or ("v6" in kind)           # 128 MiB VMEM gens
    vmem_cap = (100 if big_vmem else 48) * 1024 * 1024    # leave headroom vs physical
    if batch_tile is None:
        batch_tile = 1024 if big_vmem else 512            # v7x: smaller tiles, 2 TCs

    cbytes = jnp.dtype(compute_dtype).itemsize
    obytes = jnp.dtype(out_dtype).itemsize

    # Batch tiling: >= 2 grid steps when B allows it (megacore on v7x, keeps the
    # x/out pipeline double-buffered); shrink TB if the VMEM estimate overflows.
    B8 = _round_up(B, 8)
    TB = _round_up(min(batch_tile, max(8, B8 // 2)), 8)
    while TB > 8 and _vmem_estimate(TB, S_pad, H_pad, A_pad, action_dim,
                                    cbytes, obytes) > 0.9 * vmem_cap:
        TB = _round_up(TB // 2, 8)
    B_pad = _round_up(B, TB)
    grid = (B_pad // TB,)

    # Single fused cast+pad of x (zero rows/cols contribute nothing downstream).
    x_c = x.astype(compute_dtype)
    if (B_pad, S_pad) != (B, state_dim):
        x_c = jnp.pad(x_c, ((0, B_pad - B), (0, S_pad - state_dim)))

    # Scheduling hints (output bytes counted at the narrow width).
    flops = 2 * B_pad * (S_pad * H_pad + H_pad * H_pad + H_pad * A_pad)
    bytes_accessed = (
        B_pad * S_pad * cbytes
        + (S_pad * H_pad + H_pad * H_pad + H_pad * A_pad) * cbytes
        + (2 * H_pad + action_dim) * 4
        + B_pad * action_dim * obytes
    )
    cost = pl.CostEstimate(flops=flops, transcendentals=0,
                           bytes_accessed=bytes_accessed)

    vmem_est = _vmem_estimate(TB, S_pad, H_pad, A_pad, action_dim, cbytes, obytes)
    vmem_limit = int(min(max(int(1.5 * vmem_est), 32 * 1024 * 1024), vmem_cap))

    out = pl.pallas_call(
        qnet_kernel,
        out_shape=jax.ShapeDtypeStruct((B_pad, action_dim), out_dtype),
        grid=grid,
        in_specs=[
            pl.BlockSpec((TB, S_pad), lambda i: (i, 0)),       # x tile (pipelined)
            pl.BlockSpec((S_pad, H_pad), lambda i: (0, 0)),    # w1 (resident)
            pl.BlockSpec((1, H_pad), lambda i: (0, 0)),        # b1 (resident)
            pl.BlockSpec((H_pad, H_pad), lambda i: (0, 0)),    # w2 (resident)
            pl.BlockSpec((1, H_pad), lambda i: (0, 0)),        # b2 (resident)
            pl.BlockSpec((H_pad, A_pad), lambda i: (0, 0)),    # w3 (resident)
            pl.BlockSpec((1, action_dim), lambda i: (0, 0)),   # b3 (narrow, resident)
        ],
        out_specs=pl.BlockSpec((TB, action_dim), lambda i: (i, 0)),  # narrow writeback
        compiler_params=pltpu.CompilerParams(
            dimension_semantics=("parallel",),   # batch axis -> both TCs on v7x
            vmem_limit_bytes=vmem_limit,
        ),
        cost_estimate=cost,
    )(x_c, prepared["w1"], prepared["b1"], prepared["w2"], prepared["b2"],
      prepared["w3"], prepared["b3"])

    # Only batch padding (if any) needs stripping; columns are already exact.
    return out[:B] if B_pad != B else out


def init_qnet_params(key, state_dim, hidden_dim, action_dim):
    """Deterministic init mimicking PyTorch Linear's U(-1/sqrt(in), 1/sqrt(in))."""
    def linear(key, fan_in, fan_out):
        kw, kb = jax.random.split(key)
        bound = 1.0 / jnp.sqrt(jnp.float32(fan_in))
        w = jax.random.uniform(kw, (fan_in, fan_out), jnp.float32, -bound, bound)
        b = jax.random.uniform(kb, (1, fan_out), jnp.float32, -bound, bound)
        return w, b

    k1, k2, k3 = jax.random.split(key, 3)
    w1, b1 = linear(k1, state_dim, hidden_dim)
    w2, b2 = linear(k2, hidden_dim, hidden_dim)
    w3, b3 = linear(k3, hidden_dim, action_dim)
    return dict(w1=w1, b1=b1, w2=w2, b2=b2, w3=w3, b3=b3)


def qnet_reference(x, p):
    h1 = jnp.maximum(x @ p["w1"] + p["b1"], 0.0)
    h2 = jnp.maximum(h1 @ p["w2"] + p["b2"], 0.0)
    return h2 @ p["w3"] + p["b3"]


if __name__ == "__main__":
    batch, state_dim, hidden_dim, action_dim = 2, 4, 32, 2

    key = jax.random.PRNGKey(0)
    kx, kp = jax.random.split(key)
    x = jax.random.normal(kx, (batch, state_dim), jnp.float32)
    params = init_qnet_params(kp, state_dim, hidden_dim, action_dim)

    prepared = prepare_qnet_params(params)          # one-time pad/cast of weights
    out = qnet_forward(x, prepared)
    out = jax.block_until_ready(out)

    ref = qnet_reference(x, params)                 # f32 reference
    assert out.shape == (batch, action_dim), out.shape
    # bf16 operands / f32 accumulation: allow bf16-level tolerance vs f32 ref.
    assert jnp.allclose(out, ref, atol=5e-2, rtol=5e-2), (out, ref)

    print("KERNEL_OK")
</pallas_src>

<mosaic_0001>
module attributes {stable_mosaic.version = 11 : i64} {
  func.func @qnet_kernel(%arg0: i32, %arg1: memref<8x8xbf16, #tpu.memory_space<vmem>>, %arg2: memref<8x128xbf16, #tpu.memory_space<vmem>>, %arg3: memref<1x128xf32, #tpu.memory_space<vmem>>, %arg4: memref<128x128xbf16, #tpu.memory_space<vmem>>, %arg5: memref<1x128xf32, #tpu.memory_space<vmem>>, %arg6: memref<128x128xbf16, #tpu.memory_space<vmem>>, %arg7: memref<1x2xf32, #tpu.memory_space<vmem>>, %arg8: memref<8x2xf32, #tpu.memory_space<vmem>>) attributes {dimension_semantics = [#tpu.dimension_semantics<parallel>], iteration_bounds = array<i64: 1>, scalar_prefetch = 0 : i64, scratch_operands = 0 : i64, tpu.core_type = #tpu.core_type<tc>, window_params = [{transform_indices = @transform_0, window_bounds = array<i64: 8, 8>}, {pipeline_mode = #tpu.pipeline_mode<synchronous>, transform_indices = @transform_1, window_bounds = array<i64: 8, 128>}, {pipeline_mode = #tpu.pipeline_mode<synchronous>, transform_indices = @transform_2, window_bounds = array<i64: 1, 128>}, {pipeline_mode = #tpu.pipeline_mode<synchronous>, transform_indices = @transform_3, window_bounds = array<i64: 128, 128>}, {pipeline_mode = #tpu.pipeline_mode<synchronous>, transform_indices = @transform_4, window_bounds = array<i64: 1, 128>}, {pipeline_mode = #tpu.pipeline_mode<synchronous>, transform_indices = @transform_5, window_bounds = array<i64: 128, 128>}, {pipeline_mode = #tpu.pipeline_mode<synchronous>, transform_indices = @transform_6, window_bounds = array<i64: 1, 2>}, {transform_indices = @transform_7, window_bounds = array<i64: 8, 2>}]} {
    %c0 = arith.constant 0 : index
    %c0_0 = arith.constant 0 : index
    %0 = vector.load %arg1[%c0, %c0_0] : memref<8x8xbf16, #tpu.memory_space<vmem>>, vector<8x8xbf16>
    %c0_1 = arith.constant 0 : index
    %c0_2 = arith.constant 0 : index
    %1 = vector.load %arg2[%c0_1, %c0_2] : memref<8x128xbf16, #tpu.memory_space<vmem>>, vector<8x128xbf16>
    %cst = arith.constant dense<0.000000e+00> : vector<8x128xf32>
    %2 = tpu.matmul %0, %1, %cst {dimension_numbers = #tpu.dot_dimension_numbers<[1], [0], [0], [1], [0, 0, 1, 1], [], []>} : vector<8x8xbf16>, vector<8x128xbf16>, vector<8x128xf32> -> vector<8x128xf32>
    %c0_3 = arith.constant 0 : index
    %c0_4 = arith.constant 0 : index
    %3 = vector.load %arg3[%c0_3, %c0_4] : memref<1x128xf32, #tpu.memory_space<vmem>>, vector<1x128xf32>
    %4 = vector.broadcast %3 : vector<1x128xf32> to vector<8x128xf32>
    %5 = arith.addf %2, %4 : vector<8x128xf32>
    %cst_5 = arith.constant 0.000000e+00 : f32
    %6 = vector.broadcast %cst_5 : f32 to vector<8x128xf32>
    %7 = arith.maximumf %5, %6 : vector<8x128xf32>
    %8 = arith.truncf %7 : vector<8x128xf32> to vector<8x128xbf16>
    %c0_6 = arith.constant 0 : index
    %c0_7 = arith.constant 0 : index
    %9 = vector.load %arg4[%c0_6, %c0_7] : memref<128x128xbf16, #tpu.memory_space<vmem>>, vector<128x128xbf16>
    %cst_8 = arith.constant dense<0.000000e+00> : vector<8x128xf32>
    %10 = tpu.matmul %8, %9, %cst_8 {dimension_numbers = #tpu.dot_dimension_numbers<[1], [0], [0], [1], [0, 0, 1, 1], [], []>} : vector<8x128xbf16>, vector<128x128xbf16>, vector<8x128xf32> -> vector<8x128xf32>
    %c0_9 = arith.constant 0 : index
    %c0_10 = arith.constant 0 : index
    %11 = vector.load %arg5[%c0_9, %c0_10] : memref<1x128xf32, #tpu.memory_space<vmem>>, vector<1x128xf32>
    %12 = vector.broadcast %11 : vector<1x128xf32> to vector<8x128xf32>
    %13 = arith.addf %10, %12 : vector<8x128xf32>
    %cst_11 = arith.constant 0.000000e+00 : f32
    %14 = vector.broadcast %cst_11 : f32 to vector<8x128xf32>
    %15 = arith.maximumf %13, %14 : vector<8x128xf32>
    %16 = arith.truncf %15 : vector<8x128xf32> to vector<8x128xbf16>
    %c0_12 = arith.constant 0 : index
    %c0_13 = arith.constant 0 : index
    %17 = vector.load %arg6[%c0_12, %c0_13] : memref<128x128xbf16, #tpu.memory_space<vmem>>, vector<128x128xbf16>
    %cst_14 = arith.constant dense<0.000000e+00> : vector<8x128xf32>
    %18 = tpu.matmul %16, %17, %cst_14 {dimension_numbers = #tpu.dot_dimension_numbers<[1], [0], [0], [1], [0, 0, 1, 1], [], []>} : vector<8x128xbf16>, vector<128x128xbf16>, vector<8x128xf32> -> vector<8x128xf32>
    %19 = vector.extract_strided_slice %18 {offsets = [0, 0], sizes = [8, 2], strides = [1, 1]} : vector<8x128xf32> to vector<8x2xf32>
    %c0_15 = arith.constant 0 : index
    %c0_16 = arith.constant 0 : index
    %20 = vector.load %arg7[%c0_15, %c0_16] : memref<1x2xf32, #tpu.memory_space<vmem>>, vector<1x2xf32>
    %21 = vector.broadcast %20 : vector<1x2xf32> to vector<8x2xf32>
    %22 = arith.addf %19, %21 : vector<8x2xf32>
    %c0_17 = arith.constant 0 : index
    %c0_18 = arith.constant 0 : index
    %23 = vector.load %arg8[%c0_17, %c0_18] : memref<8x2xf32, #tpu.memory_space<vmem>>, vector<8x2xf32>
    tpu.vector_store %arg8[%c0_17, %c0_18], %22 {strides = array<i32>} : memref<8x2xf32, #tpu.memory_space<vmem>>, vector<8x2xf32>,
    return
  }
  func.func @transform_0(%arg0: i32) -> (i32, i32) {
    %c0_i32 = arith.constant 0 : i32
    %c0_i32_0 = arith.constant 0 : i32
    return %arg0, %c0_i32 : i32, i32
  }
  func.func @transform_1(%arg0: i32) -> (i32, i32) {
    %c0_i32 = arith.constant 0 : i32
    %c0_i32_0 = arith.constant 0 : i32
    %c0_i32_1 = arith.constant 0 : i32
    return %c0_i32, %c0_i32_0 : i32, i32
  }
  func.func @transform_2(%arg0: i32) -> (i32, i32) {
    %c0_i32 = arith.constant 0 : i32
    %c0_i32_0 = arith.constant 0 : i32
    %c0_i32_1 = arith.constant 0 : i32
    return %c0_i32, %c0_i32_0 : i32, i32
  }
  func.func @transform_3(%arg0: i32) -> (i32, i32) {
    %c0_i32 = arith.constant 0 : i32
    %c0_i32_0 = arith.constant 0 : i32
    %c0_i32_1 = arith.constant 0 : i32
    return %c0_i32, %c0_i32_0 : i32, i32
  }
  func.func @transform_4(%arg0: i32) -> (i32, i32) {
    %c0_i32 = arith.constant 0 : i32
    %c0_i32_0 = arith.constant 0 : i32
    %c0_i32_1 = arith.constant 0 : i32
    return %c0_i32, %c0_i32_0 : i32, i32
  }
  func.func @transform_5(%arg0: i32) -> (i32, i32) {
    %c0_i32 = arith.constant 0 : i32
    %c0_i32_0 = arith.constant 0 : i32
    %c0_i32_1 = arith.constant 0 : i32
    return %c0_i32, %c0_i32_0 : i32, i32
  }
  func.func @transform_6(%arg0: i32) -> (i32, i32) {
    %c0_i32 = arith.constant 0 : i32
    %c0_i32_0 = arith.constant 0 : i32
    %c0_i32_1 = arith.constant 0 : i32
    return %c0_i32, %c0_i32_0 : i32, i32
  }
  func.func @transform_7(%arg0: i32) -> (i32, i32) {
    %c0_i32 = arith.constant 0 : i32
    %c0_i32_0 = arith.constant 0 : i32
    return %arg0, %c0_i32 : i32, i32
  }
}

</mosaic_0001>

<bundles_post_ra>
// kernel: tpu_custom_call.1
= control target key start
LH: loop header
LB: loop body
LE: loop exit
PB: predicated region body
PF: predicated region fallthrough
CT: control target
= control target key end

     0   :  { %12 = vsyncpa [#allocation3], 0  ;;  %s706_s0 = inlined_call_operand.hbm [shape: bf16[8,8], index: 0, kind: input, shape index: {}]   ;;  %s707_s1 = inlined_call_operand.hbm [shape: bf16[8,128], index: 1, kind: input, shape index: {}]   ;;  %s708_s2 = inlined_call_operand.vmem [shape: f32[1,128], index: 2, kind: input, shape index: {}]   ;;  %s709_s3 = inlined_call_operand.hbm [shape: bf16[128,128], index: 3, kind: input, shape index: {}]   ;;  %s710_s4 = inlined_call_operand.vmem [shape: f32[1,128], index: 4, kind: input, shape index: {}]   ;;  %s711_s5 = inlined_call_operand.hbm [shape: bf16[128,128], index: 5, kind: input, shape index: {}]   ;;  %s712_s6 = inlined_call_operand.vmem [shape: f32[1,2], index: 6, kind: input, shape index: {}]   ;;  %s713_s7 = inlined_call_operand.vmem [shape: f32[8,2], index: 7, kind: output, shape index: {}]  }
   0x1   :  { %13 = vsyncpa [#allocation5], 0 }
   0x2   :  { %14 = vsyncpa [#allocation8], 0  ;;  %s575_s24 = smov [#allocation4]   ;;  %s576_s26 = smov [#allocation2]  }
   0x3   :  { %s31_s25 = sshll.u32 %s575_s24, 4  ;;  %s21_s27 = sshll.u32 %s576_s26, 4  ;;  %s32_s25 = int_to_ptr.vmem [resolvable:$true] %s31_s25  ;;  %s22_s27 = int_to_ptr.vmem [resolvable:$true] %s21_s27 }
   0x4   :  { %s481_s30 = scalar_lea.hbm %s707_s1, 64 }
   0x5   :  { %p482_p0 = scmp.ne.s32.totalorder %s707_s1, %s481_s30  ;;  %p485_p1 = scmp.lt.u32.totalorder %s481_s30, %s707_s1 }
   0x7   :  { %p487_p2 = pnand %p485_p1, %p482_p0 }
   0x9   :  { %490 = shalt.err (!%p487_p2)
}
   0xa   :  { %s491_s12 = scalar_lea.vmem %s32_s25, 64  ;;  %p496_p4 = scmp.lt.s32.totalorder %s32_s25, %s32_s25 }
   0xb   :  { %p492_p3 = scmp.ne.s32.totalorder %s32_s25, %s491_s12  ;;  %p497_p5 = scmp.lt.s32.totalorder %s491_s12, %s491_s12 }
   0xd   :  { %p498_p6 = por %p497_p5, %p496_p4 }
   0xf   :  { %p499_p7 = pnand %p498_p6, %p492_p3 }
  0x11   :  { %502 = shalt.err (!%p499_p7)
}
  0x12   :  { %34 = dma.hbm_to_vmem [thread:$0]  %s707_s1, 64, %s32_s25, [#allocation5]  }
  0x13   :  { %s503_s17 = scalar_lea.hbm %s706_s0, 64 }
  0x14   :  { %p504_p8 = scmp.ne.s32.totalorder %s706_s0, %s503_s17  ;;  %p507_p9 = scmp.lt.u32.totalorder %s503_s17, %s706_s0 }
  0x16   :  { %p509_p10 = pnand %p507_p9, %p504_p8 }
  0x18   :  { %512 = shalt.err (!%p509_p10)
}
  0x19   :  { %s513_s22 = scalar_lea.vmem %s22_s27, 64  ;;  %p518_p12 = scmp.lt.s32.totalorder %s22_s27, %s22_s27 }
  0x1a   :  { %p514_p11 = scmp.ne.s32.totalorder %s22_s27, %s513_s22  ;;  %p519_p13 = scmp.lt.s32.totalorder %s513_s22, %s513_s22 }
  0x1c   :  { %p520_p0 = por %p519_p13, %p518_p12 }
  0x1e   :  { %p521_p1 = pnand %p520_p0, %p514_p11 }
  0x20   :  { %524 = shalt.err (!%p521_p1)
}
  0x21   :  { %24 = dma.hbm_to_vmem [thread:$0]  %s706_s0, 64, %s22_s27, [#allocation3]  }
  0x22   :  { %s577_s24 = smov [#allocation6]   ;;  %s525_s29 = scalar_lea.hbm %s709_s3, 1024 }
  0x23   :  { %s42_s25 = sshll.u32 %s577_s24, 4  ;;  %p526_p2 = scmp.ne.s32.totalorder %s709_s3, %s525_s29  ;;  %s43_s25 = int_to_ptr.vmem [resolvable:$true] %s42_s25 }
  0x24   :  { %p529_p3 = scmp.lt.u32.totalorder %s525_s29, %s709_s3 }
  0x26   :  { %p531_p4 = pnand %p529_p3, %p526_p2 }
  0x28   :  { %534 = shalt.err (!%p531_p4)
}
  0x29   :  { %s535_s11 = scalar_lea.vmem %s43_s25, 1024  ;;  %p540_p6 = scmp.lt.s32.totalorder %s43_s25, %s43_s25 }
  0x2a   :  { %p536_p5 = scmp.ne.s32.totalorder %s43_s25, %s535_s11  ;;  %p541_p7 = scmp.lt.s32.totalorder %s535_s11, %s535_s11 }
  0x2c   :  { %p542_p8 = por %p541_p7, %p540_p6 }
  0x2e   :  { %p543_p9 = pnand %p542_p8, %p536_p5 }
  0x30   :  { %546 = shalt.err (!%p543_p9)
}
  0x31   :  { %s578_s0 = smov 64   ;;  %s579_s27 = smov 4  }
  0x32   :  { %48 = dma.hbm_to_vmem [thread:$0]  %s709_s3, 1024, %s43_s25, [#allocation5], %s578_s0, %s578_s0, %s579_s27  }
  0x33   :  { %s580_s14 = smov [#allocation7]   ;;  %s547_s18 = scalar_lea.hbm %s711_s5, 1024 }
  0x34   :  { %s56_s15 = sshll.u32 %s580_s14, 4  ;;  %p548_p10 = scmp.ne.s32.totalorder %s711_s5, %s547_s18  ;;  %s57_s15 = int_to_ptr.vmem [resolvable:$true] %s56_s15 }
  0x35   :  { %p551_p11 = scmp.lt.u32.totalorder %s547_s18, %s711_s5 }
  0x37   :  { %p553_p12 = pnand %p551_p11, %p548_p10 }
  0x39   :  { %556 = shalt.err (!%p553_p12)
}
  0x3a   :  { %s557_s1 = scalar_lea.vmem %s57_s15, 1024  ;;  %p562_p0 = scmp.lt.s32.totalorder %s57_s15, %s57_s15 }
  0x3b   :  { %p558_p13 = scmp.ne.s32.totalorder %s57_s15, %s557_s1  ;;  %p563_p1 = scmp.lt.s32.totalorder %s557_s1, %s557_s1 }
  0x3d   :  { %p564_p2 = por %p563_p1, %p562_p0 }
  0x3f   :  { %p565_p3 = pnand %p564_p2, %p558_p13 }
  0x41   :  { %568 = shalt.err (!%p565_p3)
}
  0x42   :  { %62 = dma.hbm_to_vmem [thread:$0]  %s711_s5, 1024, %s57_s15, [#allocation8], %s578_s0, %s578_s0, %s579_s27  }
  0x43   :  { %569 = dma.done.wait [#allocation3], 64  }
  0x44   :  { %570 = vsyncadd [#allocation3], 4294967232 }
  0x45   :  { %571 = dma.done.wait [#allocation5], 1088  }
  0x46   :  { %572 = vsyncadd [#allocation5], 4294966208 }
  0x47   :  { %573 = dma.done.wait [#allocation8], 1024  }
  0x48   :  { %574 = vsyncadd [#allocation8], 4294966272  ;;  %v581_v0 = vmov 0.0   ;;  %vm582_vm0 = vmmov 0   ;;  %vm91_vm1 = vcmask 1043456   ;;  %vm87_vm2 = vcmask 64512  }
  0x49   :  { %411 = vmatprep.subr.bf16.mxu0 %v581_v0  ;;  %413 = vmatprep.mubr.msk.bf16.mxu0 %vm582_vm0, %v581_v0  ;;  %v79_v1 = vld [vmem:[#allocation4] sm:$0xf]  ;;  %v465_v3 = vld [vmem:[#allocation6] sm:$0xff]   ;;  %v78_v4 = vld [vmem:[#allocation2] sm:$0xf]  ;;  %vm362_vm3 = vcmask 15360  }
  0x4a   :  { %417 = vmatprep.subr.bf16.mxu1 %v581_v0  ;;  %433 = vmatprep.mubr.msk.bf16.mxu1 %vm582_vm0, %v581_v0  ;;  %v93_v2 = vsel %vm91_vm1, %v79_v1, 0  ;;  %v466_v5 = vld [vmem:[#allocation6 + $0x8] sm:$0xff]   ;;  %v467_v6 = vld [vmem:[#allocation6 + $0x10] sm:$0xff]   ;;  %v468_v7 = vld [vmem:[#allocation6 + $0x18] sm:$0xff]  }
  0x4b   :  { %412 = vmatpush3.bf16.msra.mxu0 %v93_v2  ;;  %418 = vmatpush3.bf16.msra.mxu1 %v465_v3  ;;  %v469_v8 = vld [vmem:[#allocation6 + $0x20] sm:$0xff]   ;;  %v470_v9 = vld [vmem:[#allocation6 + $0x28] sm:$0xff]   ;;  %v471_v10 = vld [vmem:[#allocation6 + $0x30] sm:$0xff]  }
  0x4c   :  { %437 = vmatprep.subr.bf16.mxu0 %v581_v0  ;;  %419 = vmatprep.subr.bf16.mxu1 %v581_v0  ;;  %v472_v11 = vld [vmem:[#allocation6 + $0x38] sm:$0xff]   ;;  %v473_v12 = vld [vmem:[#allocation7] sm:$0xff]   ;;  %v474_v13 = vld [vmem:[#allocation7 + $0x8] sm:$0xff]  }
  0x4d   :  { %v475_v14 = vld [vmem:[#allocation7 + $0x10] sm:$0xff]   ;;  %v476_v15 = vld [vmem:[#allocation7 + $0x18] sm:$0xff]   ;;  %v477_v16 = vld [vmem:[#allocation7 + $0x20] sm:$0xff]  }
  0x4e   :  { %414 = vmatmul.mubr.msk.bf16.vlgmr.msra.gmra.mrb[0].mxu0 %vm87_vm2, %v78_v4  ;;  %v478_v17 = vld [vmem:[#allocation7 + $0x28] sm:$0xff]   ;;  %v371_v18 = vld [vmem:[%s708_s2] ss:$0 sm:$0xff]  ;;  %v479_v26 = vld [vmem:[#allocation7 + $0x30] sm:$0xff]  }
  0x4f   :  { %453 = vmatprep.mubr.msk.bf16.mxu0 %vm582_vm0, %v581_v0  ;;  %420 = vmatpush3.bf16.msra.mxu1 %v466_v5  ;;  %v480_v27 = vld [vmem:[#allocation7 + $0x38] sm:$0xff]  }
  0x50   :  { %421 = vmatprep.subr.bf16.mxu1 %v581_v0  ;;  %438 = vmatpush3.bf16.msra.mxu0 %v473_v12  ;;  %v373_v28 = vld [vmem:[%s710_s4] ss:$0 sm:$0xff] }
  0x51   :  { %439 = vmatprep.subr.bf16.mxu0 %v581_v0  ;;  %v390_v36 = vld [vmem:[%s712_s6] ss:$0 sm:$0xff] }
  0x53   :  { %422 = vmatpush3.bf16.msra.mxu1 %v467_v6 }
  0x54   :  { %423 = vmatprep.subr.bf16.mxu1 %v581_v0  ;;  %440 = vmatpush3.bf16.msra.mxu0 %v474_v13 }
  0x55   :  { %441 = vmatprep.subr.bf16.mxu0 %v581_v0 }
  0x57   :  { %424 = vmatpush3.bf16.msra.mxu1 %v468_v7 }
  0x58   :  { %425 = vmatprep.subr.bf16.mxu1 %v581_v0  ;;  %442 = vmatpush3.bf16.msra.mxu0 %v475_v14 }
  0x59   :  { %443 = vmatprep.subr.bf16.mxu0 %v581_v0 }
  0x5b   :  { %426 = vmatpush3.bf16.msra.mxu1 %v469_v8 }
  0x5c   :  { %427 = vmatprep.subr.bf16.mxu1 %v581_v0  ;;  %444 = vmatpush3.bf16.msra.mxu0 %v476_v15 }
  0x5d   :  { %445 = vmatprep.subr.bf16.mxu0 %v581_v0 }
  0x5f   :  { %428 = vmatpush3.bf16.msra.mxu1 %v470_v9 }
  0x60   :  { %429 = vmatprep.subr.bf16.mxu1 %v581_v0  ;;  %446 = vmatpush3.bf16.msra.mxu0 %v477_v16 }
  0x61   :  { %447 = vmatprep.subr.bf16.mxu0 %v581_v0 }
  0x63   :  { %430 = vmatpush3.bf16.msra.mxu1 %v471_v10 }
  0x64   :  { %431 = vmatprep.subr.bf16.mxu1 %v581_v0  ;;  %448 = vmatpush3.bf16.msra.mxu0 %v478_v17 }
  0x65   :  { %449 = vmatprep.subr.bf16.mxu0 %v581_v0 }
  0x67   :  { %432 = vmatpush3.bf16.msra.mxu1 %v472_v11 }
  0x68   :  { %450 = vmatpush3.bf16.msra.mxu0 %v479_v26 }
  0x69   :  { %451 = vmatprep.subr.bf16.mxu0 %v581_v0 }
  0x6c   :  { %452 = vmatpush3.bf16.msra.mxu0 %v480_v27 }
 0x121   :  { %v129_v19 = vpop.f32.mrb[0].mxu0 }
 0x122   :  { %v130_v20 = vadd.f32 %v371_v18, %v129_v19  ;;  %v415_v21 = vpop.f32.mrb[1].mxu0 }
 0x123   :  { %v132_v22 = vpop.f32.mrb[2].mxu0 }
 0x124   :  { %v135_v23 = vmax.f32 %v130_v20, 0.0  ;;  %v416_v24 = vpop.f32.mrb[3].mxu0 }
 0x126   :  { %v136_v25 = vpack.c.bf16 %v135_v23, %v135_v23 }
 0x128   :  { %434 = vmatmul.mubr.bf16.vlgmr.msra.gmra.mrb[0].mxu1 %v136_v25 }
 0x1fb   :  { %v242_v29 = vpop.f32.mrb[0].mxu1 }
 0x1fc   :  { %v243_v30 = vadd.f32 %v373_v28, %v242_v29  ;;  %v435_v31 = vpop.f32.mrb[1].mxu1 }
 0x1fd   :  { %v245_v32 = vpop.f32.mrb[2].mxu1 }
 0x1fe   :  { %v248_v33 = vmax.f32 %v243_v30, 0.0  ;;  %v436_v34 = vpop.f32.mrb[3].mxu1 }
 0x200   :  { %v249_v35 = vpack.c.bf16 %v248_v33, %v248_v33 }
 0x202   :  { %454 = vmatmul.mubr.bf16.vlgmr.msra.gmra.mrb[4].mxu0 %v249_v35 }
 0x2d5   :  { %v348_v37 = vpop.f32.mrb[4].mxu0 }
 0x2d6   :  { %v361_v38 = vadd.f32 %v390_v36, %v348_v37  ;;  %v455_v39 = vpop.f32.mrb[5].mxu0 }
 0x2d7   :  { %v351_v40 = vpop.f32.mrb[6].mxu0 }
 0x2d8   :  { %363 = vst.msk [vmem:[%s713_s7] sm:$0xff] %vm362_vm3, %v361_v38  ;;  %v456_v41 = vpop.f32.mrb[7].mxu0 }
 0x2d9   :  { %368 = vsyncpa [#allocation3], 1 }
 0x2da   :  { %369 = vsyncpa [#allocation5], 1 }
 0x2db   :  { %370 = vsyncpa [#allocation8], 1 }

</bundles_post_ra>
